<compile_context>
chip_gen: v6e
topology: v6e:2x2x1
jax: 0.10.0
libtpu: 0.0.40
codegen_flags: <defaults>
</compile_context>

<pallas_src>
import functools

import jax
import jax.numpy as jnp
from jax.experimental import pallas as pl
from jax.experimental.pallas import tpu as pltpu


def _round_up(n, m):
    return ((n + m - 1) // m) * m


# ----------------------------------------------------------------------------------
# Pass A: per-channel sum / sum-of-squares of the 1x1-conv output (stats only; the
# conv output itself is never written to HBM).
# ----------------------------------------------------------------------------------
def _conv_stats_kernel(x_ref, wt_ref, stats_ref):
    i = pl.program_id(0)

    @pl.when(i == 0)
    def _():
        stats_ref[...] = jnp.zeros_like(stats_ref)

    y = jnp.dot(x_ref[...], wt_ref[...], preferred_element_type=jnp.float32)
    stats_ref[...] += jnp.concatenate(
        [jnp.sum(y, axis=0, keepdims=True),
         jnp.sum(y * y, axis=0, keepdims=True)], axis=0)


def _conv_stats(xf, conv_wt):
    # xf: (N, C1) bf16 (zero rows, if padded, contribute 0 to both sums).
    N, C1 = xf.shape
    C2 = conv_wt.shape[1]
    tile = min(1024, _round_up(N, 8))
    npad = _round_up(N, tile)
    if npad != N:
        xf = jnp.pad(xf, ((0, npad - N), (0, 0)))
    grid = (npad // tile,)
    return pl.pallas_call(
        _conv_stats_kernel,
        out_shape=jax.ShapeDtypeStruct((2, C2), jnp.float32),
        grid=grid,
        in_specs=[pl.BlockSpec((tile, C1), lambda i: (i, 0)),
                  pl.BlockSpec((C1, C2), lambda i: (0, 0))],
        out_specs=pl.BlockSpec((2, C2), lambda i: (0, 0)),
        compiler_params=pltpu.CompilerParams(dimension_semantics=("arbitrary",)),
    )(xf, conv_wt)


# ----------------------------------------------------------------------------------
# Shared in-kernel helper: 1x1 conv matmul + BatchNorm (train-mode batch stats) + SiLU
# ----------------------------------------------------------------------------------
def _conv_bn_silu_tile(x_ref, cw_ref, stats_ref, g_ref, b_ref, inv_n):
    y = jnp.dot(x_ref[...], cw_ref[...], preferred_element_type=jnp.float32)
    mean = stats_ref[0:1, :] * inv_n
    # Biased batch variance as E[y^2]-E[y]^2 (f32); see review note on cancellation.
    var = stats_ref[1:2, :] * inv_n - mean * mean
    z = g_ref[...] * (y - mean) * jax.lax.rsqrt(var + 1e-5) + b_ref[...]
    return z * jax.nn.sigmoid(z)                      # SiLU


# ----------------------------------------------------------------------------------
# Fused:  [Conv+BN+SiLU] + (p + Linear(p)) + ALL TransformerLayers  -- one pallas_call
# grid = (B, num_layers); activation resident in a VMEM scratch across the layer axis.
# ----------------------------------------------------------------------------------
def _fused_kernel(num_heads, has_conv, inv_n, *refs):
    if has_conv:
        (x_ref, cw_ref, stats_ref, g_ref, bta_ref,
         lw_ref, lb_ref, wqkv_ref, bqkv_ref, wo_ref, bo_ref,
         w1_ref, w2_ref, o_ref, act_ref) = refs
    else:
        (x_ref, lw_ref, lb_ref, wqkv_ref, bqkv_ref, wo_ref, bo_ref,
         w1_ref, w2_ref, o_ref, act_ref) = refs

    l = pl.program_id(1)
    S, C = act_ref.shape
    D = C // num_heads

    # Layer 0 of each batch element: conv+BN+SiLU (if present) and p + linear(p).
    @pl.when(l == 0)
    def _():
        if has_conv:
            p0 = _conv_bn_silu_tile(x_ref, cw_ref, stats_ref, g_ref, bta_ref, inv_n)
        else:
            p0 = x_ref[...]
        emb = jnp.dot(p0.astype(jnp.bfloat16), lw_ref[...],
                      preferred_element_type=jnp.float32)
        act_ref[...] = p0 + emb + lb_ref[...]

    x = act_ref[...]                                   # (S, C) f32
    xb = x.astype(jnp.bfloat16)

    # Per-head attention: fori_loop bounds the (S,S) score live-set to one head and
    # the out-projection is folded into the accumulation (no concat / no lane slicing).
    def head_body(h, acc):
        qkv_h = jnp.dot(xb, wqkv_ref[h],
                        preferred_element_type=jnp.float32) + bqkv_ref[h]   # (S, 3D)
        qh = qkv_h[:, 0:D].astype(jnp.bfloat16)        # 1/sqrt(D) already folded in
        kh = qkv_h[:, D:2 * D].astype(jnp.bfloat16)
        vh = qkv_h[:, 2 * D:3 * D].astype(jnp.bfloat16)
        s = jax.lax.dot_general(qh, kh, (((1,), (1,)), ((), ())),
                                preferred_element_type=jnp.float32)         # (S, S)
        m = jnp.max(s, axis=-1, keepdims=True)
        e = jnp.exp(s - m)
        # approx reciprocal on the EUP; attention rows sum to 1 only approximately.
        inv = pl.reciprocal(jnp.sum(e, axis=-1, keepdims=True), approx=True)
        p_attn = (e * inv).astype(jnp.bfloat16)
        o_h = jnp.dot(p_attn, vh, preferred_element_type=jnp.float32)       # (S, D)
        return acc + jnp.dot(o_h.astype(jnp.bfloat16), wo_ref[h],
                             preferred_element_type=jnp.float32)            # (S, C)

    attn = jax.lax.fori_loop(0, num_heads, head_body,
                             jnp.zeros((S, C), jnp.float32)) + bo_ref[...]

    x = x + attn                                        # residual 1
    xb2 = x.astype(jnp.bfloat16)
    h1 = jnp.dot(xb2, w1_ref[...], preferred_element_type=jnp.float32)
    x = x + jnp.dot(h1.astype(jnp.bfloat16), w2_ref[...],
                    preferred_element_type=jnp.float32)  # fc2(fc1(x)) + x
    act_ref[...] = x

    @pl.when(l == pl.num_programs(1) - 1)
    def _():
        o_ref[...] = x


def _vmem_estimate(S, C, Cin, num_heads):
    D = max(C // num_heads, 1)
    est = 0
    est += S * C * 4                                   # resident activation scratch
    est += 2 * S * C * 4                               # double-buffered output block
    est += 2 * S * max(Cin, 8) * 4                     # double-buffered input block
    est += 3 * S * S * 4                               # one head's scores/exp/softmax
    est += 8 * S * C * 4                               # x, attn acc, MLP temporaries
    est += 4 * (num_heads * (C * 3 * D + D * C) * 2 + 3 * C * C * 2)  # layer weights
    est = int(est * 1.25) + (4 << 20)
    return max(32 << 20, min(est, 64 << 20))           # stay valid on v7x (64 MiB)


def _fused_block(p_in, packed, stats, inv_n, has_conv):
    B, S, Cin = p_in.shape
    C = packed["c2"]
    L = packed["num_layers"]
    H = packed["num_heads"]
    D = C // H

    kernel = functools.partial(_fused_kernel, H, has_conv, inv_n)

    in_specs = [pl.BlockSpec((None, S, Cin), lambda b, l: (b, 0, 0))]
    args = [p_in]
    if has_conv:
        in_specs += [
            pl.BlockSpec((Cin, C), lambda b, l: (0, 0)),             # conv weight
            pl.BlockSpec((2, C), lambda b, l: (0, 0)),               # BN batch stats
            pl.BlockSpec((1, C), lambda b, l: (0, 0)),               # gamma
            pl.BlockSpec((1, C), lambda b, l: (0, 0)),               # beta
        ]
        args += [packed["conv_wt"], stats, packed["bn_gamma"], packed["bn_beta"]]
    in_specs += [
        pl.BlockSpec((C, C), lambda b, l: (0, 0)),                   # embed linear weight
        pl.BlockSpec((1, C), lambda b, l: (0, 0)),                   # embed linear bias
        pl.BlockSpec((None, H, C, 3 * D), lambda b, l: (l, 0, 0, 0)),  # per-head qkv W
        pl.BlockSpec((None, H, 1, 3 * D), lambda b, l: (l, 0, 0, 0)),  # per-head qkv b
        pl.BlockSpec((None, H, D, C), lambda b, l: (l, 0, 0, 0)),      # per-head out W
        pl.BlockSpec((None, 1, C), lambda b, l: (l, 0, 0)),            # out-proj bias
        pl.BlockSpec((None, C, C), lambda b, l: (l, 0, 0)),            # fc1
        pl.BlockSpec((None, C, C), lambda b, l: (l, 0, 0)),            # fc2
    ]
    args += [packed["lin_wt"], packed["lin_b"],
             packed["wqkv_h"], packed["bqkv_h"], packed["wo_h"], packed["bo"],
             packed["w1_t"], packed["w2_t"]]

    return pl.pallas_call(
        kernel,
        out_shape=jax.ShapeDtypeStruct((B, S, C), jnp.float32),
        grid=(B, L),
        in_specs=in_specs,
        out_specs=pl.BlockSpec((None, S, C), lambda b, l: (b, 0, 0)),
        scratch_shapes=[pltpu.VMEM((S, C), jnp.float32)],
        compiler_params=pltpu.CompilerParams(
            dimension_semantics=("parallel", "arbitrary"),
            vmem_limit_bytes=_vmem_estimate(S, C, Cin, H)),
    )(*args)


# ----------------------------------------------------------------------------------
# num_layers == 0 path: conv+BN+SiLU (optional) + embed only
# ----------------------------------------------------------------------------------
def _embed_kernel(has_conv, inv_n, *refs):
    if has_conv:
        (x_ref, cw_ref, stats_ref, g_ref, bta_ref, lw_ref, lb_ref, o_ref) = refs
        p0 = _conv_bn_silu_tile(x_ref, cw_ref, stats_ref, g_ref, bta_ref, inv_n)
    else:
        (x_ref, lw_ref, lb_ref, o_ref) = refs
        p0 = x_ref[...]
    emb = jnp.dot(p0.astype(jnp.bfloat16), lw_ref[...],
                  preferred_element_type=jnp.float32)
    o_ref[...] = p0 + emb + lb_ref[...]


def _embed_only(p_in, packed, stats, inv_n, has_conv):
    B, S, Cin = p_in.shape
    C = packed["c2"]
    kernel = functools.partial(_embed_kernel, has_conv, inv_n)
    in_specs = [pl.BlockSpec((None, S, Cin), lambda b: (b, 0, 0))]
    args = [p_in]
    if has_conv:
        in_specs += [pl.BlockSpec((Cin, C), lambda b: (0, 0)),
                     pl.BlockSpec((2, C), lambda b: (0, 0)),
                     pl.BlockSpec((1, C), lambda b: (0, 0)),
                     pl.BlockSpec((1, C), lambda b: (0, 0))]
        args += [packed["conv_wt"], stats, packed["bn_gamma"], packed["bn_beta"]]
    in_specs += [pl.BlockSpec((C, C), lambda b: (0, 0)),
                 pl.BlockSpec((1, C), lambda b: (0, 0))]
    args += [packed["lin_wt"], packed["lin_b"]]
    return pl.pallas_call(
        kernel,
        out_shape=jax.ShapeDtypeStruct((B, S, C), jnp.float32),
        grid=(B,),
        in_specs=in_specs,
        out_specs=pl.BlockSpec((None, S, C), lambda b: (b, 0, 0)),
        compiler_params=pltpu.CompilerParams(dimension_semantics=("parallel",)),
    )(*args)


# ----------------------------------------------------------------------------------
# Full TransformerBlock forward
# ----------------------------------------------------------------------------------
def transformer_block_forward(x, packed):
    c2 = packed["c2"]
    B, c1, W, H = x.shape
    S = W * H
    L = packed["num_layers"]
    has_conv = "conv_wt" in packed

    if has_conv:
        # Single layout pass over the (small-channel) input; feeds both the stats
        # pass and the fused block.  Row order (b, w, h) == PyTorch flatten(2).
        xf = x.transpose(0, 2, 3, 1).reshape(B * S, c1).astype(jnp.bfloat16)
        stats = _conv_stats(xf, packed["conv_wt"])
        p_in = xf.reshape(B, S, c1)
        inv_n = 1.0 / float(B * S)
    else:
        p_in = x.reshape(B, c2, S).transpose(0, 2, 1)   # (B, S, C) f32
        stats = None
        inv_n = 1.0

    if L == 0:
        out = _embed_only(p_in, packed, stats, inv_n, has_conv)
    else:
        out = _fused_block(p_in, packed, stats, inv_n, has_conv)

    # Only now go back to NCHW (reference: .permute(1,2,0).reshape(b, c2, w, h)).
    return out.transpose(0, 2, 1).reshape(B, c2, W, H)


# ----------------------------------------------------------------------------------
# Parameter init (PyTorch-convention weights) and host-side packing/folding
# ----------------------------------------------------------------------------------
def init_params(key, c1, c2, num_layers):
    ks = jax.random.split(key, 3 + max(num_layers, 1))
    sc = 1.0 / (c2 ** 0.5)
    params = {"c2": c2}
    if c1 != c2:
        kc = jax.random.split(ks[0], 3)
        params["conv_w"] = jax.random.normal(kc[0], (c2, c1), jnp.float32) / (c1 ** 0.5)
        params["bn_gamma"] = 1.0 + 0.1 * jax.random.normal(kc[1], (c2,), jnp.float32)
        params["bn_beta"] = 0.1 * jax.random.normal(kc[2], (c2,), jnp.float32)
    kl = jax.random.split(ks[1], 2)
    params["lin_w"] = jax.random.normal(kl[0], (c2, c2), jnp.float32) * sc
    params["lin_b"] = 0.1 * jax.random.normal(kl[1], (c2,), jnp.float32)
    layers = []
    for li in range(num_layers):
        kk = jax.random.split(ks[2 + li], 13)
        layers.append({
            "wq": jax.random.normal(kk[0], (c2, c2), jnp.float32) * sc,
            "wk": jax.random.normal(kk[1], (c2, c2), jnp.float32) * sc,
            "wv": jax.random.normal(kk[2], (c2, c2), jnp.float32) * sc,
            "wiq": jax.random.normal(kk[3], (c2, c2), jnp.float32) * sc,
            "wik": jax.random.normal(kk[4], (c2, c2), jnp.float32) * sc,
            "wiv": jax.random.normal(kk[5], (c2, c2), jnp.float32) * sc,
            "biq": 0.1 * jax.random.normal(kk[6], (c2,), jnp.float32),
            "bik": 0.1 * jax.random.normal(kk[7], (c2,), jnp.float32),
            "biv": 0.1 * jax.random.normal(kk[8], (c2,), jnp.float32),
            "wo": jax.random.normal(kk[9], (c2, c2), jnp.float32) * sc,
            "bo": 0.1 * jax.random.normal(kk[12], (c2,), jnp.float32),
            "w1": jax.random.normal(kk[10], (c2, c2), jnp.float32) * sc,
            "w2": jax.random.normal(kk[11], (c2, c2), jnp.float32) * sc,
        })
    params["layers"] = layers
    return params


def pack_params(p, num_heads):
    """Fold chained projections + 1/sqrt(D), group q/k/v columns per head, pre-transpose
    to (in,out), cast matmul weights to bf16, stack layers on a leading axis."""
    c2 = p["c2"]
    D = c2 // num_heads
    scale = 1.0 / float(D) ** 0.5
    packed = {"c2": c2, "num_layers": len(p["layers"]), "num_heads": num_heads}
    if "conv_w" in p:
        packed["conv_wt"] = p["conv_w"].T.astype(jnp.bfloat16)          # (c1, c2)
        packed["bn_gamma"] = p["bn_gamma"].reshape(1, c2).astype(jnp.float32)
        packed["bn_beta"] = p["bn_beta"].reshape(1, c2).astype(jnp.float32)
    packed["lin_wt"] = p["lin_w"].T.astype(jnp.bfloat16)                # (c2, c2)
    packed["lin_b"] = p["lin_b"].reshape(1, c2).astype(jnp.float32)
    wqkv_h, bqkv_h, wo_h, bo, w1, w2 = [], [], [], [], [], []
    for lp in p["layers"]:
        # q2 = x @ (Wiq @ Wq).T + biq  ->  effective (in,out) weight = Wq.T @ Wiq.T
        wq_t = (lp["wq"].T @ lp["wiq"].T) * scale       # 1/sqrt(D) folded into q
        wk_t = lp["wk"].T @ lp["wik"].T
        wv_t = lp["wv"].T @ lp["wiv"].T
        biq = lp["biq"] * scale
        per_head_w, per_head_b = [], []
        for h in range(num_heads):
            sl = slice(h * D, (h + 1) * D)
            per_head_w.append(jnp.concatenate(
                [wq_t[:, sl], wk_t[:, sl], wv_t[:, sl]], axis=1))        # (c2, 3D)
            per_head_b.append(jnp.concatenate(
                [biq[sl], lp["bik"][sl], lp["biv"][sl]]).reshape(1, 3 * D))
        wqkv_h.append(jnp.stack(per_head_w))                            # (H, c2, 3D)
        bqkv_h.append(jnp.stack(per_head_b))                            # (H, 1, 3D)
        wo_h.append(lp["wo"].T.reshape(num_heads, D, c2))               # (H, D, c2)
        bo.append(lp["bo"].reshape(1, c2))
        w1.append(lp["w1"].T)
        w2.append(lp["w2"].T)
    if p["layers"]:
        packed["wqkv_h"] = jnp.stack(wqkv_h).astype(jnp.bfloat16)       # (L, H, c2, 3D)
        packed["bqkv_h"] = jnp.stack(bqkv_h).astype(jnp.float32)        # (L, H, 1, 3D)
        packed["wo_h"] = jnp.stack(wo_h).astype(jnp.bfloat16)           # (L, H, D, c2)
        packed["bo"] = jnp.stack(bo).astype(jnp.float32)                # (L, 1, c2)
        packed["w1_t"] = jnp.stack(w1).astype(jnp.bfloat16)             # (L, c2, c2)
        packed["w2_t"] = jnp.stack(w2).astype(jnp.bfloat16)             # (L, c2, c2)
    return packed


if __name__ == "__main__":
    B, c1, W, H = 2, 4, 16, 16
    c2, num_heads, num_layers = 32, 4, 2

    key = jax.random.PRNGKey(0)
    kx, kp = jax.random.split(key)
    x = jax.random.normal(kx, (B, c1, W, H), jnp.float32)
    params = init_params(kp, c1, c2, num_layers)
    packed = pack_params(params, num_heads)

    out = transformer_block_forward(x, packed)
    out = jax.block_until_ready(out)
    assert out.shape == (B, c2, W, H), out.shape
    assert bool(jnp.all(jnp.isfinite(out)))
    print("KERNEL_OK")
</pallas_src>

<mosaic_0001>
module attributes {stable_mosaic.version = 11 : i64} {
  func.func @_conv_stats_kernel(%arg0: i32, %arg1: memref<512x4xbf16, #tpu.memory_space<vmem>>, %arg2: memref<4x32xbf16, #tpu.memory_space<vmem>>, %arg3: memref<2x32xf32, #tpu.memory_space<vmem>>) attributes {dimension_semantics = [#tpu.dimension_semantics<arbitrary>], iteration_bounds = array<i64: 1>, scalar_prefetch = 0 : i64, scratch_operands = 0 : i64, tpu.core_type = #tpu.core_type<tc>, window_params = [{transform_indices = @transform_0, window_bounds = array<i64: 512, 4>}, {pipeline_mode = #tpu.pipeline_mode<synchronous>, transform_indices = @transform_1, window_bounds = array<i64: 4, 32>}, {pipeline_mode = #tpu.pipeline_mode<synchronous>, transform_indices = @transform_2, window_bounds = array<i64: 2, 32>}]} {
    %c0_i32 = arith.constant 0 : i32
    %0 = arith.cmpi eq, %arg0, %c0_i32 : i32
    %1 = arith.extui %0 : i1 to i32
    %c0_i32_0 = arith.constant 0 : i32
    %2 = arith.cmpi ne, %1, %c0_i32_0 : i32
    scf.if %2 {
      %cst_10 = arith.constant 0.000000e+00 : f32
      %15 = vector.broadcast %cst_10 : f32 to vector<2x32xf32>
      %c0_11 = arith.constant 0 : index
      %c0_12 = arith.constant 0 : index
      %16 = vector.load %arg3[%c0_11, %c0_12] : memref<2x32xf32, #tpu.memory_space<vmem>>, vector<2x32xf32>
      tpu.vector_store %arg3[%c0_11, %c0_12], %15 {strides = array<i32>} : memref<2x32xf32, #tpu.memory_space<vmem>>, vector<2x32xf32>,
    } else {
    }
    %c0 = arith.constant 0 : index
    %c0_1 = arith.constant 0 : index
    %3 = vector.load %arg1[%c0, %c0_1] : memref<512x4xbf16, #tpu.memory_space<vmem>>, vector<512x4xbf16>
    %c0_2 = arith.constant 0 : index
    %c0_3 = arith.constant 0 : index
    %4 = vector.load %arg2[%c0_2, %c0_3] : memref<4x32xbf16, #tpu.memory_space<vmem>>, vector<4x32xbf16>
    %cst = arith.constant dense<0.000000e+00> : vector<512x32xf32>
    %5 = tpu.matmul %3, %4, %cst {dimension_numbers = #tpu.dot_dimension_numbers<[1], [0], [0], [1], [0, 0, 1, 1], [], []>} : vector<512x4xbf16>, vector<4x32xbf16>, vector<512x32xf32> -> vector<512x32xf32>
    %c0_4 = arith.constant 0 : index
    %c0_5 = arith.constant 0 : index
    %6 = vector.load %arg3[%c0_4, %c0_5] : memref<2x32xf32, #tpu.memory_space<vmem>>, vector<2x32xf32>
    %cst_6 = arith.constant dense<0.000000e+00> : vector<32xf32>
    %7 = vector.multi_reduction <add>, %5, %cst_6 [0] : vector<512x32xf32> to vector<32xf32>
    %8 = vector.shape_cast %7 : vector<32xf32> to vector<1x32xf32>
    %9 = arith.mulf %5, %5 : vector<512x32xf32>
    %cst_7 = arith.constant dense<0.000000e+00> : vector<32xf32>
    %10 = vector.multi_reduction <add>, %9, %cst_7 [0] : vector<512x32xf32> to vector<32xf32>
    %11 = vector.shape_cast %10 : vector<32xf32> to vector<1x32xf32>
    %12 = tpu.concatenate %8, %11 in 0 : vector<1x32xf32>, vector<1x32xf32> -> vector<2x32xf32>
    %13 = arith.addf %6, %12 : vector<2x32xf32>
    %c0_8 = arith.constant 0 : index
    %c0_9 = arith.constant 0 : index
    %14 = vector.load %arg3[%c0_8, %c0_9] : memref<2x32xf32, #tpu.memory_space<vmem>>, vector<2x32xf32>
    tpu.vector_store %arg3[%c0_8, %c0_9], %13 {strides = array<i32>} : memref<2x32xf32, #tpu.memory_space<vmem>>, vector<2x32xf32>,
    return
  }
  func.func @transform_0(%arg0: i32) -> (i32, i32) {
    %c0_i32 = arith.constant 0 : i32
    %c0_i32_0 = arith.constant 0 : i32
    return %arg0, %c0_i32 : i32, i32
  }
  func.func @transform_1(%arg0: i32) -> (i32, i32) {
    %c0_i32 = arith.constant 0 : i32
    %c0_i32_0 = arith.constant 0 : i32
    %c0_i32_1 = arith.constant 0 : i32
    return %c0_i32, %c0_i32_0 : i32, i32
  }
  func.func @transform_2(%arg0: i32) -> (i32, i32) {
    %c0_i32 = arith.constant 0 : i32
    %c0_i32_0 = arith.constant 0 : i32
    %c0_i32_1 = arith.constant 0 : i32
    return %c0_i32, %c0_i32_0 : i32, i32
  }
}

</mosaic_0001>

<bundles_post_ra>
// kernel: tpu_custom_call.1
= control target key start
LH: loop header
LB: loop body
LE: loop exit
PB: predicated region body
PF: predicated region fallthrough
CT: control target
= control target key end

     0   :  { %vm341_vm0 = vcmask 1041408   ;;  %vm244_vm1 = vcmask 31744   ;;  %s1609_s0 = inlined_call_operand.vmem [shape: bf16[512,4], index: 0, kind: input, shape index: {}]   ;;  %s1610_s1 = inlined_call_operand.vmem [shape: bf16[4,32], index: 1, kind: input, shape index: {}]   ;;  %s1611_s2 = inlined_call_operand.hbm [shape: f32[2,32], index: 2, kind: output, shape index: {}]  }
   0x1   :  { %v83_v0 = vld [vmem:[%s1610_s1] sm:$0x3]  ;;  %v1155_v3 = vld [vmem:[%s1609_s0 + $0x8] sm:$0xff]   ;;  %v1156_v4 = vld [vmem:[%s1609_s0 + $0x10] sm:$0xff]  }
   0x2   :  { %v1154_v1 = vld [vmem:[%s1609_s0] sm:$0xff]   ;;  %1150 = vmatprep.subr.msk.bf16.mxu0 %vm341_vm0, %v83_v0  ;;  %v343_v2 = vsel %vm341_vm0, %v83_v0, 0  ;;  %1151 = vmatprep.subr.msk.bf16.mxu1 %vm341_vm0, %v83_v0  ;;  %v1157_v5 = vld [vmem:[%s1609_s0 + $0x18] sm:$0xff]   ;;  %v1159_v7 = vld [vmem:[%s1609_s0 + $0x28] sm:$0xff]  }
   0x3   :  { %1083 = vmatpush3.bf16.msra.mxu0 %v343_v2  ;;  %1084 = vmatprep.mubr.msk.bf16.mxu0 %vm244_vm1, %v1154_v1  ;;  %v1158_v6 = vld [vmem:[%s1609_s0 + $0x20] sm:$0xff]   ;;  %v1160_v8 = vld [vmem:[%s1609_s0 + $0x30] sm:$0xff]   ;;  %v1171_v10 = vld [vmem:[%s1609_s0 + $0x88] sm:$0xff]  }
   0x4   :  { %1149 = vmatpush3.bf16.msra.mxu1 %v343_v2  ;;  %v1170_v9 = vld [vmem:[%s1609_s0 + $0x80] sm:$0xff]   ;;  %v1172_v11 = vld [vmem:[%s1609_s0 + $0x90] sm:$0xff]   ;;  %v1161_v12 = vld [vmem:[%s1609_s0 + $0x38] sm:$0xff]  }
   0x5   :  { %1116 = vmatprep.mubr.msk.bf16.mxu1 %vm244_vm1, %v1170_v9  ;;  %v1173_v13 = vld [vmem:[%s1609_s0 + $0x98] sm:$0xff]   ;;  %v1174_v14 = vld [vmem:[%s1609_s0 + $0xa0] sm:$0xff]   ;;  %v1175_v16 = vld [vmem:[%s1609_s0 + $0xa8] sm:$0xff]  }
   0x6   :  { %1085 = vmatmul.mubr.msk.bf16.vlgmr.msra.gmra.mxu0 %vm244_vm1, %v1155_v3  ;;  %v1162_v15 = vld [vmem:[%s1609_s0 + $0x40] sm:$0xff]  }
   0x7   :  { %1088 = vmatprep.mubr.msk.bf16.mxu0 %vm244_vm1, %v1156_v4  ;;  %1117 = vmatmul.mubr.msk.bf16.vlgmr.msra.gmra.mxu1 %vm244_vm1, %v1171_v10 }
   0x8   :  { %1120 = vmatprep.mubr.msk.bf16.mxu1 %vm244_vm1, %v1172_v11 }
   0xe   :  { %1089 = vmatmul.mubr.msk.bf16.gmra.mxu0 %vm244_vm1, %v1157_v5 }
   0xf   :  { %1092 = vmatprep.mubr.msk.bf16.mxu0 %vm244_vm1, %v1158_v6  ;;  %1121 = vmatmul.mubr.msk.bf16.gmra.mxu1 %vm244_vm1, %v1173_v13 }
  0x10   :  { %1124 = vmatprep.mubr.msk.bf16.mxu1 %vm244_vm1, %v1174_v14 }
  0x16   :  { %1093 = vmatmul.mubr.msk.bf16.gmra.mxu0 %vm244_vm1, %v1159_v7 }
  0x17   :  { %1096 = vmatprep.mubr.msk.bf16.mxu0 %vm244_vm1, %v1160_v8 }
  0x1e   :  { %1097 = vmatmul.mubr.msk.bf16.gmra.mxu0 %vm244_vm1, %v1161_v12 }
  0x1f   :  { %1100 = vmatprep.mubr.msk.bf16.mxu0 %vm244_vm1, %v1162_v15 }
  0x20   :  { %7 = vsyncpa [#allocation3], 0  ;;  %v1163_v17 = vld [vmem:[%s1609_s0 + $0x48] sm:$0xff]   ;;  %v1176_v18 = vld [vmem:[%s1609_s0 + $0xb0] sm:$0xff]   ;;  %1125 = vmatmul.mubr.msk.bf16.gmra.mxu1 %vm244_vm1, %v1175_v16  ;;  %vm635_vm2 = vcmask 261120   ;;  %vm17_vm3 = vcmask 254976  }
  0x21   :  { %v1164_v19 = vld [vmem:[%s1609_s0 + $0x50] sm:$0xff]   ;;  %1128 = vmatprep.mubr.msk.bf16.mxu1 %vm244_vm1, %v1176_v18  ;;  %v1177_v20 = vld [vmem:[%s1609_s0 + $0xb8] sm:$0xff]   ;;  %v1178_v22 = vld [vmem:[%s1609_s0 + $0xc0] sm:$0xff]   ;;  %v1208_v60 = vmov 0.0   ;;  %vm966_vm4 = vcmask 1040384  }
  0x22   :  { %v1165_v21 = vld [vmem:[%s1609_s0 + $0x58] sm:$0xff]   ;;  %v1166_v23 = vld [vmem:[%s1609_s0 + $0x60] sm:$0xff]   ;;  %v1179_v24 = vld [vmem:[%s1609_s0 + $0xc8] sm:$0xff]   ;;  %18 = vst.msk [vmem:[#allocation2] sm:$0x3] %vm17_vm3, %v1208_v60 }
  0x23   :  { %v1167_v25 = vld [vmem:[%s1609_s0 + $0x68] sm:$0xff]   ;;  %v1180_v26 = vld [vmem:[%s1609_s0 + $0xd0] sm:$0xff]   ;;  %v1181_v28 = vld [vmem:[%s1609_s0 + $0xd8] sm:$0xff]  }
  0x24   :  { %v1168_v27 = vld [vmem:[%s1609_s0 + $0x70] sm:$0xff]   ;;  %v1169_v29 = vld [vmem:[%s1609_s0 + $0x78] sm:$0xff]   ;;  %v1182_v30 = vld [vmem:[%s1609_s0 + $0xe0] sm:$0xff]  }
  0x25   :  { %v1183_v31 = vld [vmem:[%s1609_s0 + $0xe8] sm:$0xff]   ;;  %v1184_v32 = vld [vmem:[%s1609_s0 + $0xf0] sm:$0xff]   ;;  %v1185_v33 = vld [vmem:[%s1609_s0 + $0xf8] sm:$0xff]   ;;  %s1209_s0 = smov [#allocation2]  }
  0x26   :  { %1101 = vmatmul.mubr.msk.bf16.gmra.mxu0 %vm244_vm1, %v1163_v17  ;;  %s977_s1 = sshll.u32 %s1209_s0, 4  ;;  %s978_s1 = int_to_ptr.vmem [resolvable:$true] %s977_s1 }
  0x27   :  { %1104 = vmatprep.mubr.msk.bf16.mxu0 %vm244_vm1, %v1164_v19  ;;  %s1186_s17 = scalar_lea.vmem %s978_s1, 32  ;;  %p1191_p1 = scmp.lt.s32.totalorder %s978_s1, %s978_s1 }
  0x28   :  { %1129 = vmatmul.mubr.msk.bf16.gmra.mxu1 %vm244_vm1, %v1177_v20  ;;  %p1187_p0 = scmp.ne.s32.totalorder %s978_s1, %s1186_s17  ;;  %p1192_p2 = scmp.lt.s32.totalorder %s1186_s17, %s1186_s17 }
  0x29   :  { %1132 = vmatprep.mubr.msk.bf16.mxu1 %vm244_vm1, %v1178_v22 }
  0x2a   :  { %p1193_p3 = por %p1192_p2, %p1191_p1 }
  0x2c   :  { %p1194_p4 = pnand %p1193_p3, %p1187_p0 }
  0x2e   :  { %1105 = vmatmul.mubr.msk.bf16.gmra.mxu0 %vm244_vm1, %v1165_v21 }
  0x2f   :  { %1108 = vmatprep.mubr.msk.bf16.mxu0 %vm244_vm1, %v1166_v23 }
  0x30   :  { %1133 = vmatmul.mubr.msk.bf16.gmra.mxu1 %vm244_vm1, %v1179_v24 }
  0x31   :  { %1136 = vmatprep.mubr.msk.bf16.mxu1 %vm244_vm1, %v1180_v26 }
  0x36   :  { %1109 = vmatmul.mubr.msk.bf16.gmra.mxu0 %vm244_vm1, %v1167_v25 }
  0x37   :  { %1112 = vmatprep.mubr.msk.bf16.mxu0 %vm244_vm1, %v1168_v27 }
  0x38   :  { %1137 = vmatmul.mubr.msk.bf16.gmra.mxu1 %vm244_vm1, %v1181_v28 }
  0x39   :  { %1140 = vmatprep.mubr.msk.bf16.mxu1 %vm244_vm1, %v1182_v30 }
  0x3e   :  { %1113 = vmatmul.mubr.msk.bf16.gmra.mxu0 %vm244_vm1, %v1169_v29 }
  0x40   :  { %1141 = vmatmul.mubr.msk.bf16.gmra.mxu1 %vm244_vm1, %v1183_v31 }
  0x41   :  { %1144 = vmatprep.mubr.msk.bf16.mxu1 %vm244_vm1, %v1184_v32 }
  0x48   :  { %1145 = vmatmul.mubr.msk.bf16.gmra.mxu1 %vm244_vm1, %v1185_v33 }
  0xc6   :  { %v1086_v34 = vpop.f32.mrf.mxu0 }
  0xc7   :  { %v771_v39 = vmul.f32 %v1086_v34, %v1086_v34  ;;  %v639_v45 = vsel %vm635_vm2, %v1086_v34, 0.0  ;;  %v1368_v4 = vpop.f32.mrf.mxu1 }
  0xc8   :  { %v379_v35 = vpop.f32.mrf.mxu0 }
  0xc9   :  { %v769_v37 = vmul.f32 %v379_v35, %v379_v35  ;;  %v636_v40 = vsel %vm635_vm2, %v379_v35, 0.0  ;;  %v836_v52 = vsel %vm635_vm2, %v771_v39, 0.0  ;;  %v1372_v11 = vpop.f32.mrf.mxu1 }
  0xca   :  { %v1087_v36 = vpop.f32.mrf.mxu0 }
  0xcb   :  { %v833_v46 = vsel %vm635_vm2, %v769_v37, 0.0  ;;  %v772_v47 = vmul.f32 %v1087_v36, %v1087_v36  ;;  %v641_v53 = vsel %vm635_vm2, %v1087_v36, 0.0  ;;  %v1376_v18 = vpop.f32.mrf.mxu1 }
  0xcc   :  { %v382_v38 = vpop.f32.mrf.mxu0 }
  0xcd   :  { %v637_v41 = vsel %vm635_vm2, %v382_v38, 0.0  ;;  %v770_v42 = vmul.f32 %v382_v38, %v382_v38  ;;  %v838_v58 = vsel %vm635_vm2, %v772_v47, 0.0  ;;  %v1380_v24 = vpop.f32.mrf.mxu1 }
  0xce   :  { %v638_v43 = vadd.f32 %v637_v41, %v636_v40  ;;  %v1090_v44 = vpop.f32.mrf.mxu0 }
  0xcf   :  { %v834_v48 = vsel %vm635_vm2, %v770_v42, 0.0  ;;  %v775_v0 = vmul.f32 %v1090_v44, %v1090_v44  ;;  %v647_v8 = vsel %vm635_vm2, %v1090_v44, 0.0  ;;  %v1384_v32 = vpop.f32.mrf.mxu1 }
  0xd0   :  { %v640_v49 = vadd.f32 %v639_v45, %v638_v43  ;;  %v835_v50 = vadd.f32 %v834_v48, %v833_v46  ;;  %v395_v51 = vpop.f32.mrf.mxu0 }
  0xd1   :  { %v773_v54 = vmul.f32 %v395_v51, %v395_v51  ;;  %v643_v59 = vsel %vm635_vm2, %v395_v51, 0.0  ;;  %v844_v15 = vsel %vm635_vm2, %v775_v0, 0.0  ;;  %v1388_v39 = vpop.f32.mrf.mxu1 }
  0xd2   :  { %v837_v55 = vadd.f32 %v836_v52, %v835_v50  ;;  %v642_v56 = vadd.f32 %v641_v53, %v640_v49  ;;  %v1091_v57 = vpop.f32.mrf.mxu0 }
  0xd3   :  { %v840_v1 = vsel %vm635_vm2, %v773_v54, 0.0  ;;  %v776_v9 = vmul.f32 %v1091_v57, %v1091_v57  ;;  %v649_v16 = vsel %vm635_vm2, %v1091_v57, 0.0  ;;  %v1392_v46 = vpop.f32.mrf.mxu1 }
  0xd4   :  { %v644_v61 = vadd.f32 %v643_v59, %v642_v56  ;;  %v839_v62 = vadd.f32 %v838_v58, %v837_v55  ;;  %v398_v63 = vpop.f32.mrf.mxu0 }
  0xd5   :  { %v645_v2 = vsel %vm635_vm2, %v398_v63, 0.0  ;;  %v774_v3 = vmul.f32 %v398_v63, %v398_v63  ;;  %v846_v22 = vsel %vm635_vm2, %v776_v9, 0.0  ;;  %v1396_v52 = vpop.f32.mrf.mxu1 }
  0xd6   :  { %v841_v5 = vadd.f32 %v840_v1, %v839_v62  ;;  %v646_v6 = vadd.f32 %v645_v2, %v644_v61  ;;  %v1094_v7 = vpop.f32.mrf.mxu0 }
  0xd7   :  { %v842_v10 = vsel %vm635_vm2, %v774_v3, 0.0  ;;  %v779_v28 = vmul.f32 %v1094_v7, %v1094_v7  ;;  %v655_v36 = vsel %vm635_vm2, %v1094_v7, 0.0 }
  0xd8   :  { %v648_v12 = vadd.f32 %v647_v8, %v646_v6  ;;  %v843_v13 = vadd.f32 %v842_v10, %v841_v5  ;;  %v411_v14 = vpop.f32.mrf.mxu0 }
  0xd9   :  { %v777_v17 = vmul.f32 %v411_v14, %v411_v14  ;;  %v651_v23 = vsel %vm635_vm2, %v411_v14, 0.0  ;;  %v852_v43 = vsel %vm635_vm2, %v779_v28, 0.0 }
  0xda   :  { %v845_v19 = vadd.f32 %v844_v15, %v843_v13  ;;  %v650_v20 = vadd.f32 %v649_v16, %v648_v12  ;;  %v1095_v21 = vpop.f32.mrf.mxu0 }
  0xdb   :  { %v848_v29 = vsel %vm635_vm2, %v777_v17, 0.0  ;;  %v780_v37 = vmul.f32 %v1095_v21, %v1095_v21  ;;  %v657_v44 = vsel %vm635_vm2, %v1095_v21, 0.0 }
  0xdc   :  { %v652_v25 = vadd.f32 %v651_v23, %v650_v20  ;;  %v847_v26 = vadd.f32 %v846_v22, %v845_v19  ;;  %v414_v27 = vpop.f32.mrf.mxu0 }
  0xdd   :  { %v653_v30 = vsel %vm635_vm2, %v414_v27, 0.0  ;;  %v778_v31 = vmul.f32 %v414_v27, %v414_v27  ;;  %v854_v50 = vsel %vm635_vm2, %v780_v37, 0.0 }
  0xde   :  { %v849_v33 = vadd.f32 %v848_v29, %v847_v26  ;;  %v654_v34 = vadd.f32 %v653_v30, %v652_v25  ;;  %v1098_v35 = vpop.f32.mrf.mxu0 }
  0xdf   :  { %v850_v38 = vsel %vm635_vm2, %v778_v31, 0.0  ;;  %v783_v56 = vmul.f32 %v1098_v35, %v1098_v35  ;;  %v663_v0 = vsel %vm635_vm2, %v1098_v35, 0.0 }
  0xe0   :  { %v656_v40 = vadd.f32 %v655_v36, %v654_v34  ;;  %v851_v41 = vadd.f32 %v850_v38, %v849_v33  ;;  %v427_v42 = vpop.f32.mrf.mxu0  ;;  %v1400_v60 = vpop.f32.mrf.mxu1 }
  0xe1   :  { %v781_v45 = vmul.f32 %v427_v42, %v427_v42  ;;  %v659_v51 = vsel %vm635_vm2, %v427_v42, 0.0  ;;  %v860_v8 = vsel %vm635_vm2, %v783_v56, 0.0 }
  0xe2   :  { %v853_v47 = vadd.f32 %v852_v43, %v851_v41  ;;  %v658_v48 = vadd.f32 %v657_v44, %v656_v40  ;;  %v1099_v49 = vpop.f32.mrf.mxu0  ;;  %v1404_v7 = vpop.f32.mrf.mxu1 }
  0xe3   :  { %v856_v57 = vsel %vm635_vm2, %v781_v45, 0.0  ;;  %v784_v1 = vmul.f32 %v1099_v49, %v1099_v49  ;;  %v665_v9 = vsel %vm635_vm2, %v1099_v49, 0.0 }
  0xe4   :  { %v660_v53 = vadd.f32 %v659_v51, %v658_v48  ;;  %v855_v54 = vadd.f32 %v854_v50, %v853_v47  ;;  %v430_v55 = vpop.f32.mrf.mxu0  ;;  %v1410_v21 = vpop.f32.mrf.mxu1 }
  0xe5   :  { %v661_v58 = vsel %vm635_vm2, %v430_v55, 0.0  ;;  %v782_v59 = vmul.f32 %v430_v55, %v430_v55  ;;  %v862_v15 = vsel %vm635_vm2, %v784_v1, 0.0 }
  0xe6   :  { %v857_v61 = vadd.f32 %v856_v57, %v855_v54  ;;  %v662_v62 = vadd.f32 %v661_v58, %v660_v53  ;;  %v1102_v63 = vpop.f32.mrf.mxu0  ;;  %v1416_v37 = vpop.f32.mrf.mxu1 }
  0xe7   :  { %v858_v2 = vsel %vm635_vm2, %v782_v59, 0.0  ;;  %v787_v22 = vmul.f32 %v1102_v63, %v1102_v63  ;;  %v671_v30 = vsel %vm635_vm2, %v1102_v63, 0.0 }
  0xe8   :  { %v664_v3 = vadd.f32 %v663_v0, %v662_v62  ;;  %v859_v5 = vadd.f32 %v858_v2, %v857_v61  ;;  %v443_v6 = vpop.f32.mrf.mxu0  ;;  %v1422_v51 = vpop.f32.mrf.mxu1 }
  0xe9   :  { %v785_v10 = vmul.f32 %v443_v6, %v443_v6  ;;  %v667_v16 = vsel %vm635_vm2, %v443_v6, 0.0  ;;  %v868_v38 = vsel %vm635_vm2, %v787_v22, 0.0 }
  0xea   :  { %v861_v12 = vadd.f32 %v860_v8, %v859_v5  ;;  %v666_v13 = vadd.f32 %v665_v9, %v664_v3  ;;  %v1103_v14 = vpop.f32.mrf.mxu0  ;;  %v1428_v3 = vpop.f32.mrf.mxu1 }
  0xeb   :  { %v864_v23 = vsel %vm635_vm2, %v785_v10, 0.0  ;;  %v788_v31 = vmul.f32 %v1103_v14, %v1103_v14  ;;  %v673_v40 = vsel %vm635_vm2, %v1103_v14, 0.0 }
  0xec   :  { %v668_v17 = vadd.f32 %v667_v16, %v666_v13  ;;  %v863_v19 = vadd.f32 %v862_v15, %v861_v12  ;;  %v446_v20 = vpop.f32.mrf.mxu0 }
  0xed   :  { %v669_v25 = vsel %vm635_vm2, %v446_v20, 0.0  ;;  %v786_v26 = vmul.f32 %v446_v20, %v446_v20  ;;  %v870_v45 = vsel %vm635_vm2, %v788_v31, 0.0 }
  0xee   :  { %v865_v27 = vadd.f32 %v864_v23, %v863_v19  ;;  %v670_v28 = vadd.f32 %v669_v25, %v668_v17  ;;  %v1106_v29 = vpop.f32.mrf.mxu0  ;;  %v1434_v19 = vpop.f32.mrf.mxu1 }
  0xef   :  { %v866_v33 = vsel %vm635_vm2, %v786_v26, 0.0  ;;  %v791_v53 = vmul.f32 %v1106_v29, %v1106_v29  ;;  %v679_v61 = vsel %vm635_vm2, %v1106_v29, 0.0 }
  0xf0   :  { %v672_v34 = vadd.f32 %v671_v30, %v670_v28  ;;  %v867_v35 = vadd.f32 %v866_v33, %v865_v27  ;;  %v459_v36 = vpop.f32.mrf.mxu0 }
  0xf1   :  { %v789_v41 = vmul.f32 %v459_v36, %v459_v36  ;;  %v675_v47 = vsel %vm635_vm2, %v459_v36, 0.0  ;;  %v876_v5 = vsel %vm635_vm2, %v791_v53, 0.0  ;;  %v1440_v36 = vpop.f32.mrf.mxu1 }
  0xf2   :  { %v869_v42 = vadd.f32 %v868_v38, %v867_v35  ;;  %v674_v43 = vadd.f32 %v673_v40, %v672_v34  ;;  %v1107_v44 = vpop.f32.mrf.mxu0 }
  0xf3   :  { %v872_v54 = vsel %vm635_vm2, %v789_v41, 0.0  ;;  %v792_v62 = vmul.f32 %v1107_v44, %v1107_v44  ;;  %v681_v6 = vsel %vm635_vm2, %v1107_v44, 0.0  ;;  %v1446_v53 = vpop.f32.mrf.mxu1 }
  0xf4   :  { %v676_v48 = vadd.f32 %v675_v47, %v674_v43  ;;  %v871_v49 = vadd.f32 %v870_v45, %v869_v42  ;;  %v462_v50 = vpop.f32.mrf.mxu0 }
  0xf5   :  { %v677_v55 = vsel %vm635_vm2, %v462_v50, 0.0  ;;  %v790_v56 = vmul.f32 %v462_v50, %v462_v50  ;;  %v878_v13 = vsel %vm635_vm2, %v792_v62, 0.0 }
  0xf6   :  { %v873_v57 = vadd.f32 %v872_v54, %v871_v49  ;;  %v678_v58 = vadd.f32 %v677_v55, %v676_v48  ;;  %v1110_v59 = vpop.f32.mrf.mxu0 }
  0xf7   :  { %v874_v63 = vsel %vm635_vm2, %v790_v56, 0.0  ;;  %v795_v20 = vmul.f32 %v1110_v59, %v1110_v59  ;;  %v687_v29 = vsel %vm635_vm2, %v1110_v59, 0.0 }
  0xf8   :  { %v680_v0 = vadd.f32 %v679_v61, %v678_v58  ;;  %v875_v1 = vadd.f32 %v874_v63, %v873_v57  ;;  %v475_v2 = vpop.f32.mrf.mxu0 }
  0xf9   :  { %v793_v8 = vmul.f32 %v475_v2, %v475_v2  ;;  %v683_v14 = vsel %vm635_vm2, %v475_v2, 0.0  ;;  %v884_v38 = vsel %vm635_vm2, %v795_v20, 0.0  ;;  %v1452_v2 = vpop.f32.mrf.mxu1  ;;  %v803_v20 = vmul.f32 %v1368_v4, %v1368_v4 }
  0xfa   :  { %v877_v9 = vadd.f32 %v876_v5, %v875_v1  ;;  %v682_v10 = vadd.f32 %v681_v6, %v680_v0  ;;  %v1111_v12 = vpop.f32.mrf.mxu0 }
  0xfb   :  { %v880_v22 = vsel %vm635_vm2, %v793_v8, 0.0  ;;  %v796_v30 = vmul.f32 %v1111_v12, %v1111_v12  ;;  %v689_v40 = vsel %vm635_vm2, %v1111_v12, 0.0  ;;  %v801_v8 = vmul.f32 %v1372_v11, %v1372_v11 }
  0xfc   :  { %v684_v15 = vadd.f32 %v683_v14, %v682_v10  ;;  %v879_v16 = vadd.f32 %v878_v13, %v877_v9  ;;  %v478_v17 = vpop.f32.mrf.mxu0  ;;  %v699_v13 = vsel %vm635_vm2, %v1372_v11, 0.0  ;;  %v802_v14 = vmul.f32 %v1380_v24, %v1380_v24 }
  0xfd   :  { %v685_v23 = vsel %vm635_vm2, %v478_v17, 0.0  ;;  %v794_v25 = vmul.f32 %v478_v17, %v478_v17  ;;  %v886_v45 = vsel %vm635_vm2, %v796_v30, 0.0  ;;  %v1463_v17 = vpop.f32.mrf.mxu1  ;;  %v703_v11 = vsel %vm635_vm2, %v1368_v4, 0.0 }
  0xfe   :  { %v881_v26 = vadd.f32 %v880_v22, %v879_v16  ;;  %v686_v27 = vadd.f32 %v685_v23, %v684_v15  ;;  %v1114_v28 = vpop.f32.mrf.mxu0  ;;  %v896_v22 = vsel %vm635_vm2, %v801_v8, 0.0  ;;  %v701_v23 = vsel %vm635_vm2, %v1380_v24, 0.0 }
  0xff   :  { %v882_v31 = vsel %vm635_vm2, %v794_v25, 0.0  ;;  %v799_v54 = vmul.f32 %v1114_v28, %v1114_v28  ;;  %v695_v61 = vsel %vm635_vm2, %v1114_v28, 0.0  ;;  %v898_v28 = vsel %vm635_vm2, %v802_v14, 0.0 }
 0x100   :  { %v688_v33 = vadd.f32 %v687_v29, %v686_v27  ;;  %v883_v34 = vadd.f32 %v882_v31, %v881_v26  ;;  %v491_v35 = vpop.f32.mrf.mxu0  ;;  %v804_v27 = vmul.f32 %v1376_v18, %v1376_v18  ;;  %v1475_v31 = vpop.f32.mrf.mxu1  ;;  %v805_v24 = vmul.f32 %v1388_v39, %v1388_v39 }
 0x101   :  { %v797_v41 = vmul.f32 %v491_v35, %v491_v35  ;;  %v691_v47 = vsel %vm635_vm2, %v491_v35, 0.0  ;;  %v892_v5 = vsel %vm635_vm2, %v799_v54, 0.0 }
 0x102   :  { %v885_v42 = vadd.f32 %v884_v38, %v883_v34  ;;  %v690_v43 = vadd.f32 %v689_v40, %v688_v33  ;;  %v1115_v44 = vpop.f32.mrf.mxu0  ;;  %v900_v33 = vsel %vm635_vm2, %v803_v20, 0.0  ;;  %v705_v34 = vsel %vm635_vm2, %v1376_v18, 0.0 }
 0x103   :  { %v888_v55 = vsel %vm635_vm2, %v797_v41, 0.0  ;;  %v800_v62 = vmul.f32 %v1115_v44, %v1115_v44  ;;  %v697_v6 = vsel %vm635_vm2, %v1115_v44, 0.0  ;;  %v902_v4 = vsel %vm635_vm2, %v804_v27, 0.0  ;;  %v1487_v44 = vpop.f32.mrf.mxu1 }
 0x104   :  { %v692_v48 = vadd.f32 %v691_v47, %v690_v43  ;;  %v887_v49 = vadd.f32 %v886_v45, %v885_v42  ;;  %v494_v50 = vpop.f32.mrf.mxu0  ;;  %v707_v40 = vsel %vm635_vm2, %v1388_v39, 0.0  ;;  %v806_v41 = vmul.f32 %v1396_v52, %v1396_v52 }
 0x105   :  { %v693_v56 = vsel %vm635_vm2, %v494_v50, 0.0  ;;  %v798_v57 = vmul.f32 %v494_v50, %v494_v50  ;;  %v894_v12 = vsel %vm635_vm2, %v800_v62, 0.0  ;;  %v807_v18 = vmul.f32 %v1384_v32, %v1384_v32 }
 0x106   :  { %v889_v58 = vadd.f32 %v888_v55, %v887_v49  ;;  %v694_v59 = vadd.f32 %v693_v56, %v692_v48  ;;  %v904_v45 = vsel %vm635_vm2, %v805_v24, 0.0  ;;  %v709_v47 = vsel %vm635_vm2, %v1396_v52, 0.0 }
 0x107   :  { %v890_v63 = vsel %vm635_vm2, %v798_v57, 0.0  ;;  %v711_v39 = vsel %vm635_vm2, %v1384_v32, 0.0  ;;  %v808_v50 = vmul.f32 %v1392_v46, %v1392_v46  ;;  %v906_v54 = vsel %vm635_vm2, %v806_v41, 0.0  ;;  %v1499_v57 = vpop.f32.mrf.mxu1 }
 0x108   :  { %v696_v0 = vadd.f32 %v695_v61, %v694_v59  ;;  %v891_v1 = vadd.f32 %v890_v63, %v889_v58  ;;  %v908_v58 = vsel %vm635_vm2, %v807_v18, 0.0  ;;  %v713_v59 = vsel %vm635_vm2, %v1392_v46, 0.0 }
 0x109   :  { %v809_v52 = vmul.f32 %v1404_v7, %v1404_v7  ;;  %v910_v32 = vsel %vm635_vm2, %v808_v50, 0.0  ;;  %v715_v63 = vsel %vm635_vm2, %v1404_v7, 0.0  ;;  %v811_v46 = vmul.f32 %v1400_v60, %v1400_v60 }
 0x10a   :  { %v698_v9 = vadd.f32 %v697_v6, %v696_v0  ;;  %v893_v10 = vadd.f32 %v892_v5, %v891_v1  ;;  %v810_v0 = vmul.f32 %v1416_v37, %v1416_v37  ;;  %v1511_v6 = vpop.f32.mrf.mxu1  ;;  %v719_v7 = vsel %vm635_vm2, %v1400_v60, 0.0 }
 0x10b   :  { %v912_v8 = vsel %vm635_vm2, %v809_v52, 0.0  ;;  %v814_v27 = vmul.f32 %v1440_v36, %v1440_v36  ;;  %v729_v18 = vsel %vm635_vm2, %v1434_v19, 0.0  ;;  %v735_v52 = vsel %vm635_vm2, %v1446_v53, 0.0 }
 0x10c   :  { %v895_v15 = vadd.f32 %v894_v12, %v893_v10  ;;  %v700_v16 = vadd.f32 %v699_v13, %v698_v9  ;;  %v717_v9 = vsel %vm635_vm2, %v1416_v37, 0.0  ;;  %v812_v13 = vmul.f32 %v1410_v21, %v1410_v21  ;;  %v590_v20 = vpop.f32.mrf.mxu1 }
 0x10d   :  { %v914_v14 = vsel %vm635_vm2, %v810_v0, 0.0  ;;  %v813_v37 = vmul.f32 %v1428_v3, %v1428_v3 }
 0x10e   :  { %v702_v25 = vadd.f32 %v701_v23, %v700_v16  ;;  %v897_v26 = vadd.f32 %v896_v22, %v895_v15  ;;  %v916_v22 = vsel %vm635_vm2, %v811_v46, 0.0  ;;  %v721_v23 = vsel %vm635_vm2, %v1410_v21, 0.0 }
 0x10f   :  { %v918_v60 = vsel %vm635_vm2, %v812_v13, 0.0  ;;  %v815_v21 = vmul.f32 %v1422_v51, %v1422_v51  ;;  %v823_v13 = vmul.f32 %v1487_v44, %v1487_v44 }
 0x110   :  { %v704_v29 = vadd.f32 %v703_v11, %v702_v25  ;;  %v899_v30 = vadd.f32 %v898_v28, %v897_v26  ;;  %v723_v11 = vsel %vm635_vm2, %v1428_v3, 0.0  ;;  %v727_v3 = vsel %vm635_vm2, %v1422_v51, 0.0 }
 0x112   :  { %v901_v35 = vadd.f32 %v900_v33, %v899_v30  ;;  %v706_v38 = vadd.f32 %v705_v34, %v704_v29  ;;  %v1533_v30 = vpop.f32.mrf.mxu1  ;;  %v920_v33 = vsel %vm635_vm2, %v813_v37, 0.0  ;;  %v725_v34 = vsel %vm635_vm2, %v1440_v36, 0.0 }
 0x113   :  { %v817_v36 = vmul.f32 %v1452_v2, %v1452_v2 }
 0x114   :  { %v708_v42 = vadd.f32 %v707_v40, %v706_v38  ;;  %v903_v43 = vadd.f32 %v902_v4, %v901_v35  ;;  %v816_v38 = vmul.f32 %v1434_v19, %v1434_v19  ;;  %v922_v4 = vsel %vm635_vm2, %v814_v27, 0.0 }
 0x115   :  { %v928_v19 = vsel %vm635_vm2, %v817_v36, 0.0 }
 0x116   :  { %v905_v48 = vadd.f32 %v904_v45, %v903_v43  ;;  %v710_v49 = vadd.f32 %v709_v47, %v708_v42  ;;  %v603_v42 = vpop.f32.mrf.mxu1  ;;  %v924_v43 = vsel %vm635_vm2, %v815_v21, 0.0  ;;  %v926_v51 = vsel %vm635_vm2, %v816_v38, 0.0 }
 0x117   :  { %v825_v27 = vmul.f32 %v603_v42, %v603_v42 }
 0x118   :  { %v712_v55 = vadd.f32 %v711_v39, %v710_v49  ;;  %v907_v56 = vadd.f32 %v906_v54, %v905_v48  ;;  %v731_v48 = vsel %vm635_vm2, %v1452_v2, 0.0  ;;  %v818_v49 = vmul.f32 %v1475_v31, %v1475_v31  ;;  %v1143_v54 = vpop.f32.mrf.mxu1 }
 0x119   :  { %v820_v2 = vmul.f32 %v1463_v17, %v1463_v17 }
 0x11a   :  { %v909_v61 = vadd.f32 %v908_v58, %v907_v56  ;;  %v714_v62 = vadd.f32 %v713_v59, %v712_v55  ;;  %v819_v55 = vmul.f32 %v1446_v53, %v1446_v53  ;;  %v733_v56 = vsel %vm635_vm2, %v1475_v31, 0.0 }
 0x11b   :  { %v821_v31 = vmul.f32 %v1499_v57, %v1499_v57  ;;  %v934_v53 = vsel %vm635_vm2, %v820_v2, 0.0 }
 0x11c   :  { %v716_v1 = vadd.f32 %v715_v63, %v714_v62  ;;  %v911_v5 = vadd.f32 %v910_v32, %v909_v61  ;;  %v930_v61 = vsel %vm635_vm2, %v818_v49, 0.0  ;;  %v606_v63 = vpop.f32.mrf.mxu1  ;;  %v932_v0 = vsel %vm635_vm2, %v819_v55, 0.0 }
 0x11d   :  { %v826_v21 = vmul.f32 %v606_v63, %v606_v63  ;;  %v749_v38 = vsel %vm635_vm2, %v606_v63, 0.0 }
 0x11e   :  { %v913_v10 = vadd.f32 %v912_v8, %v911_v5  ;;  %v718_v12 = vadd.f32 %v717_v9, %v716_v1  ;;  %v737_v1 = vsel %vm635_vm2, %v1463_v17, 0.0  ;;  %v739_v8 = vsel %vm635_vm2, %v1499_v57, 0.0 }
 0x11f   :  { %v822_v9 = vmul.f32 %v590_v20, %v590_v20  ;;  %v741_v17 = vsel %vm635_vm2, %v590_v20, 0.0 }
 0x120   :  { %v720_v15 = vadd.f32 %v719_v7, %v718_v12  ;;  %v915_v16 = vadd.f32 %v914_v14, %v913_v10  ;;  %v1146_v7 = vpop.f32.mrf.mxu1  ;;  %v936_v14 = vsel %vm635_vm2, %v821_v31, 0.0 }
 0x121   :  { %v938_v57 = vsel %vm635_vm2, %v822_v9, 0.0 }
 0x122   :  { %v917_v25 = vadd.f32 %v916_v22, %v915_v16  ;;  %v722_v26 = vadd.f32 %v721_v23, %v720_v15  ;;  %v743_v22 = vsel %vm635_vm2, %v1487_v44, 0.0  ;;  %v824_v23 = vmul.f32 %v1511_v6, %v1511_v6 }
 0x123   :  { %v747_v44 = vsel %vm635_vm2, %v603_v42, 0.0 }
 0x124   :  { %v724_v28 = vadd.f32 %v723_v11, %v722_v26  ;;  %v919_v29 = vadd.f32 %v918_v60, %v917_v25  ;;  %v619_v26 = vpop.f32.mrf.mxu1  ;;  %v940_v60 = vsel %vm635_vm2, %v823_v13, 0.0  ;;  %v745_v11 = vsel %vm635_vm2, %v1511_v6, 0.0 }
 0x126   :  { %v921_v24 = vadd.f32 %v920_v33, %v919_v29  ;;  %v726_v35 = vadd.f32 %v725_v34, %v724_v28  ;;  %v942_v29 = vsel %vm635_vm2, %v824_v23, 0.0  ;;  %v634_v23 = vld [vmem:[#allocation2] sm:$0x3] }
 0x128   :  { %v728_v40 = vadd.f32 %v727_v3, %v726_v35  ;;  %v923_v41 = vadd.f32 %v922_v4, %v921_v24  ;;  %v1147_v24 = vpop.f32.mrf.mxu1  ;;  %v827_v35 = vmul.f32 %v1533_v30, %v1533_v30  ;;  %v944_v3 = vsel %vm635_vm2, %v825_v27, 0.0 }
 0x12a   :  { %v925_v45 = vadd.f32 %v924_v43, %v923_v41  ;;  %v730_v47 = vadd.f32 %v729_v18, %v728_v40  ;;  %v751_v40 = vsel %vm635_vm2, %v1533_v30, 0.0  ;;  %v828_v41 = vmul.f32 %v1143_v54, %v1143_v54  ;;  %v622_v36 = vpop.f32.mrf.mxu1 }
 0x12b   :  { %v946_v43 = vsel %vm635_vm2, %v826_v21, 0.0  ;;  %v830_v55 = vmul.f32 %v622_v36, %v622_v36 }
 0x12c   :  { %v732_v39 = vadd.f32 %v731_v48, %v730_v47  ;;  %v927_v50 = vadd.f32 %v926_v51, %v925_v45  ;;  %v948_v45 = vsel %vm635_vm2, %v827_v35, 0.0  ;;  %v753_v47 = vsel %vm635_vm2, %v1143_v54, 0.0 }
 0x12d   :  { %v829_v51 = vmul.f32 %v619_v26, %v619_v26  ;;  %v832_v54 = vmul.f32 %v1147_v24, %v1147_v24 }
 0x12e   :  { %v929_v58 = vadd.f32 %v928_v19, %v927_v50  ;;  %v734_v59 = vadd.f32 %v733_v56, %v732_v39  ;;  %v950_v39 = vsel %vm635_vm2, %v828_v41, 0.0  ;;  %v755_v50 = vsel %vm635_vm2, %v619_v26, 0.0 }
 0x12f   :  { %v831_v56 = vmul.f32 %v1146_v7, %v1146_v7 }
 0x130   :  { %v736_v62 = vadd.f32 %v735_v52, %v734_v59  ;;  %v931_v32 = vadd.f32 %v930_v61, %v929_v58  ;;  %v952_v58 = vsel %vm635_vm2, %v829_v51, 0.0  ;;  %v757_v59 = vsel %vm635_vm2, %v622_v36, 0.0 }
 0x131   :  { %v759_v61 = vsel %vm635_vm2, %v1146_v7, 0.0 }
 0x132   :  { %v933_v5 = vadd.f32 %v932_v0, %v931_v32  ;;  %v738_v46 = vadd.f32 %v737_v1, %v736_v62  ;;  %v954_v62 = vsel %vm635_vm2, %v830_v55, 0.0  ;;  %v956_v0 = vsel %vm635_vm2, %v831_v56, 0.0 }
 0x133   :  { %v761_v1 = vsel %vm635_vm2, %v1147_v24, 0.0 }
 0x134   :  { %v740_v10 = vadd.f32 %v739_v8, %v738_v46  ;;  %v935_v12 = vadd.f32 %v934_v53, %v933_v5  ;;  %v958_v46 = vsel %vm635_vm2, %v832_v54, 0.0 }
 0x136   :  { %v937_v15 = vadd.f32 %v936_v14, %v935_v12  ;;  %v742_v16 = vadd.f32 %v741_v17, %v740_v10 }
 0x138   :  { %v744_v37 = vadd.f32 %v743_v22, %v742_v16  ;;  %v939_v25 = vadd.f32 %v938_v57, %v937_v15 }
 0x13a   :  { %v941_v20 = vadd.f32 %v940_v60, %v939_v25  ;;  %v746_v28 = vadd.f32 %v745_v11, %v744_v37 }
 0x13c   :  { %v748_v33 = vadd.f32 %v747_v44, %v746_v28  ;;  %v943_v34 = vadd.f32 %v942_v29, %v941_v20 }
 0x13e   :  { %v945_v4 = vadd.f32 %v944_v3, %v943_v34  ;;  %v750_v6 = vadd.f32 %v749_v38, %v748_v33 }
 0x140   :  { %v752_v42 = vadd.f32 %v751_v40, %v750_v6  ;;  %v947_v18 = vadd.f32 %v946_v43, %v945_v4 }
 0x142   :  { %v949_v48 = vadd.f32 %v948_v45, %v947_v18  ;;  %v754_v49 = vadd.f32 %v753_v47, %v752_v42 }
 0x144   :  { %v756_v19 = vadd.f32 %v755_v50, %v754_v49  ;;  %v951_v30 = vadd.f32 %v950_v39, %v949_v48 }
 0x146   :  { %v953_v52 = vadd.f32 %v952_v58, %v951_v30  ;;  %v758_v2 = vadd.f32 %v757_v59, %v756_v19 }
 0x148   :  { %v760_v32 = vadd.f32 %v759_v61, %v758_v2  ;;  %v955_v63 = vadd.f32 %v954_v62, %v953_v52 }
 0x14a   :  { %v762_v31 = vadd.f32 %v761_v1, %v760_v32  ;;  %v957_v5 = vadd.f32 %v956_v0, %v955_v63 }
 0x14c   :  { %v763_v53 = vrot.slane %v762_v31, 4  ;;  %v959_v8 = vadd.f32 %v958_v46, %v957_v5 }
 0x14e   :  { %v764_v9 = vadd.f32 %v763_v53, %v762_v31  ;;  %v960_v10 = vrot.slane %v959_v8, 4 }
 0x150   :  { %v765_v12 = vrot.slane %v764_v9, 2  ;;  %v961_v13 = vadd.f32 %v960_v10, %v959_v8 }
 0x152   :  { %v766_v7 = vadd.f32 %v765_v12, %v764_v9  ;;  %v962_v14 = vrot.slane %v961_v13, 2 }
 0x154   :  { %v767_v17 = vrot.slane %v766_v7, 1  ;;  %v963_v15 = vadd.f32 %v962_v14, %v961_v13 }
 0x156   :  { %v964_v16 = vrot.slane %v963_v15, 1  ;;  %v768_v22 = vadd.f32 %v767_v17, %v766_v7 }
 0x158   :  { %v965_v57 = vadd.f32 %v964_v16, %v963_v15 }
 0x15a   :  { %v967_v37 = vsel %vm966_vm4, %v768_v22, %v965_v57 }
 0x15b   :  { %v968_v25 = vadd.f32 %v967_v37, %v634_v23 }
 0x15d   :  { %970 = vst.msk [vmem:[#allocation2] sm:$0x3] %vm17_vm3, %v968_v25 }
 0x15e   :  { %1197 = shalt.err (!%p1194_p4)
}
 0x15f   :  { %980 = dma.vmem_to_hbm [thread:$0]  %s978_s1, 32, %s1611_s2, [#allocation3]  }
 0x160   :  { %1206 = dma.done.wait [#allocation3], 32  }
 0x161   :  { %1207 = vsyncadd [#allocation3], 4294967264 }
 0x162   :  { %984 = vsyncpa [#allocation3], 1 }

</bundles_post_ra>
